<compile_context>
chip_gen: v7x
topology: tpu7x:2x2x1
jax: 0.10.0
libtpu: 0.0.40
codegen_flags: <defaults>
</compile_context>

<pallas_src>
import jax
import jax.numpy as jnp
from jax.experimental import pallas as pl
from jax.experimental.pallas import tpu as pltpu

EPS = 1e-5        # InstanceNorm2d default eps
NEG_SLOPE = 0.2   # LeakyReLU slope
K = 4             # conv kernel size


def _pick_cout_tile(cout: int) -> int:
    """Cout tile: full width when small, otherwise a lane-friendly divisor."""
    if cout <= 256:
        return cout
    for t in (256, 128):
        if cout % t == 0:
            return t
    return cout


def unet_mid2d_forward(x, weight):
    """UNetMid2d.forward.

    x:      [N, Cin, H, W]      (PyTorch NCHW)
    weight: [Cout, Cin, 4, 4]   (PyTorch Conv2d OIHW)
    returns [N, 2*Cout, H, W]   = concat(LeakyReLU(InstanceNorm(conv(x))), conv(x))
    """
    N, Cin, H, W = x.shape
    Cout = weight.shape[0]
    S = H * W
    Hp = H + K - 1              # 'same' padding for k=4, s=1: 1 before, 2 after
    Kc = K * Cin                # fused contraction width per kh tap

    tco = _pick_cout_tile(Cout)
    n_co = Cout // tco

    # ---- wrapper-side data prep (one fused XLA pass each) -----------------
    # NCHW -> NHWC (channels on the lane dim), zero-pad spatially (1 before, 2 after).
    xl = jnp.transpose(x, (0, 2, 3, 1))
    xp = jnp.pad(xl, ((0, 0), (1, 2), (1, 2), (0, 0)))
    # Pre-shift the 4 kw taps and concatenate them on the channel (lane) dim,
    # then flatten (Hp, W) -> Hp*W so each kh tap inside the kernel is a static
    # row window [kh*W : kh*W + S] of the sublane dim (aligned when W % 16 == 0).
    xsh = jnp.stack([xp[:, :, kw:kw + W, :] for kw in range(K)], axis=3)
    xsh = xsh.reshape(N, Hp, W, Kc).reshape(N, Hp * W, Kc).astype(jnp.bfloat16)

    # Per-kh fused weight matrices: wmat[kh, kw*Cin + ci, co] = weight[co, ci, kh, kw].
    wmat = jnp.transpose(weight, (2, 3, 1, 0)).reshape(K, Kc, Cout).astype(jnp.bfloat16)

    inv_s = 1.0 / float(S)

    def kernel(x_ref, w_ref, out_ref):
        # x_ref  : (Hp*W, 4*Cin)   bf16  pre-shifted padded image (one batch elem)
        # w_ref  : (4, 4*Cin, tco) bf16  per-kh fused weight matrices (one Cout tile)
        # out_ref: (2, S, tco)     bf16  [0] = LeakyReLU(InstanceNorm(y)), [1] = y
        acc = None
        for kh in range(K):
            xs = x_ref[kh * W:kh * W + S, :]               # static aligned slice
            p = jnp.dot(xs, w_ref[kh], preferred_element_type=jnp.float32)
            acc = p if acc is None else acc + p

        # Single-pass InstanceNorm stats (biased variance, per channel over S).
        s1 = jnp.sum(acc, axis=0, keepdims=True) * inv_s          # mean, (1, tco)
        s2 = jnp.sum(acc * acc, axis=0, keepdims=True) * inv_s    # E[y^2]
        var = jnp.maximum(s2 - s1 * s1, 0.0)
        inv_std = jax.lax.rsqrt(var + EPS)
        xn = (acc - s1) * inv_std
        act = jnp.maximum(xn, NEG_SLOPE * xn)                     # LeakyReLU(0.2)

        out_ref[0] = act.astype(out_ref.dtype)
        out_ref[1] = acc.astype(out_ref.dtype)

    out = pl.pallas_call(
        kernel,
        out_shape=jax.ShapeDtypeStruct((N, 2, S, Cout), jnp.bfloat16),
        grid_spec=pltpu.PrefetchScalarGridSpec(
            num_scalar_prefetch=0,
            grid=(N, n_co),
            in_specs=[
                # Image block is Cout-tile invariant -> not re-fetched across co.
                pl.BlockSpec((None, Hp * W, Kc), lambda n, co: (n, 0, 0)),
                pl.BlockSpec((K, Kc, tco), lambda n, co: (0, 0, co)),
            ],
            out_specs=pl.BlockSpec((None, 2, S, tco), lambda n, co: (n, 0, 0, co)),
        ),
        compiler_params=pltpu.CompilerParams(
            dimension_semantics=("parallel", "parallel"),
            vmem_limit_bytes=48 * 1024 * 1024,
        ),
    )(xsh, wmat)

    # Free reshape + one fused transpose/cast back to PyTorch NCHW layout.
    out = out.reshape(N, 2, H, W, Cout)
    out = jnp.transpose(out, (0, 1, 4, 2, 3)).reshape(N, 2 * Cout, H, W)
    return out.astype(x.dtype)


def reference(x, weight):
    """Pure-JAX f32 reference of the same forward (for a sanity check)."""
    y = jax.lax.conv_general_dilated(
        x, weight, window_strides=(1, 1), padding=[(1, 2), (1, 2)],
        dimension_numbers=('NCHW', 'OIHW', 'NCHW'),
        precision=jax.lax.Precision.HIGHEST)
    mean = y.mean(axis=(2, 3), keepdims=True)
    var = ((y - mean) ** 2).mean(axis=(2, 3), keepdims=True)
    xn = (y - mean) * jax.lax.rsqrt(var + EPS)
    xn = jnp.where(xn >= 0, xn, NEG_SLOPE * xn)
    return jnp.concatenate([xn, y], axis=1)


if __name__ == "__main__":
    key = jax.random.PRNGKey(0)
    k1, k2 = jax.random.split(key)

    # Small shapes: batch=2, in_size=4, out_size=4, spatial=16x16.
    N, Cin, Cout, H, W = 2, 4, 4, 16, 16
    x = jax.random.normal(k1, (N, Cin, H, W), jnp.float32)
    weight = jax.random.normal(k2, (Cout, Cin, 4, 4), jnp.float32) * 0.1

    # Pre-round inputs to bf16 (what the kernel consumes) so the f32 reference
    # comparison isolates the kernel's own numerics.
    xq = x.astype(jnp.bfloat16).astype(jnp.float32)
    wq = weight.astype(jnp.bfloat16).astype(jnp.float32)

    out = jax.jit(unet_mid2d_forward)(xq, wq)
    out = jax.block_until_ready(out)

    assert out.shape == (N, 2 * Cout, H, W), out.shape
    ref = reference(xq, wq)
    err = float(jnp.max(jnp.abs(out - ref)))
    assert err < 5e-2, f"max abs error vs reference: {err}"

    print("KERNEL_OK")
</pallas_src>

<mosaic_0001>
module attributes {stable_mosaic.version = 11 : i64} {
  func.func @kernel(%arg0: i32, %arg1: i32, %arg2: memref<1x304x16xbf16, #tpu.memory_space<vmem>>, %arg3: memref<4x16x4xbf16, #tpu.memory_space<vmem>>, %arg4: memref<1x2x256x4xbf16, #tpu.memory_space<vmem>>) attributes {dimension_semantics = [#tpu.dimension_semantics<parallel>, #tpu.dimension_semantics<parallel>], iteration_bounds = array<i64: 2, 1>, scalar_prefetch = 0 : i64, scratch_operands = 0 : i64, tpu.core_type = #tpu.core_type<tc>, window_params = [{transform_indices = @transform_0, window_bounds = array<i64: 1, 304, 16>}, {transform_indices = @transform_1, window_bounds = array<i64: 4, 16, 4>}, {transform_indices = @transform_2, window_bounds = array<i64: 1, 2, 256, 4>}]} {
    %c0 = arith.constant 0 : index
    %c0_0 = arith.constant 0 : index
    %c0_1 = arith.constant 0 : index
    %0 = vector.load %arg2[%c0, %c0_0, %c0_1] : memref<1x304x16xbf16, #tpu.memory_space<vmem>>, vector<1x256x16xbf16>
    %1 = vector.shape_cast %0 : vector<1x256x16xbf16> to vector<256x16xbf16>
    %c0_2 = arith.constant 0 : index
    %c0_3 = arith.constant 0 : index
    %c0_4 = arith.constant 0 : index
    %2 = vector.load %arg3[%c0_2, %c0_3, %c0_4] : memref<4x16x4xbf16, #tpu.memory_space<vmem>>, vector<1x16x4xbf16>
    %3 = vector.shape_cast %2 : vector<1x16x4xbf16> to vector<16x4xbf16>
    %cst = arith.constant dense<0.000000e+00> : vector<256x4xf32>
    %4 = tpu.matmul %1, %3, %cst {dimension_numbers = #tpu.dot_dimension_numbers<[1], [0], [0], [1], [0, 0, 1, 1], [], []>} : vector<256x16xbf16>, vector<16x4xbf16>, vector<256x4xf32> -> vector<256x4xf32>
    %c0_5 = arith.constant 0 : index
    %c16 = arith.constant 16 : index
    %c0_6 = arith.constant 0 : index
    %5 = vector.load %arg2[%c0_5, %c16, %c0_6] : memref<1x304x16xbf16, #tpu.memory_space<vmem>>, vector<1x256x16xbf16>
    %6 = vector.shape_cast %5 : vector<1x256x16xbf16> to vector<256x16xbf16>
    %c1 = arith.constant 1 : index
    %c0_7 = arith.constant 0 : index
    %c0_8 = arith.constant 0 : index
    %7 = vector.load %arg3[%c1, %c0_7, %c0_8] : memref<4x16x4xbf16, #tpu.memory_space<vmem>>, vector<1x16x4xbf16>
    %8 = vector.shape_cast %7 : vector<1x16x4xbf16> to vector<16x4xbf16>
    %cst_9 = arith.constant dense<0.000000e+00> : vector<256x4xf32>
    %9 = tpu.matmul %6, %8, %cst_9 {dimension_numbers = #tpu.dot_dimension_numbers<[1], [0], [0], [1], [0, 0, 1, 1], [], []>} : vector<256x16xbf16>, vector<16x4xbf16>, vector<256x4xf32> -> vector<256x4xf32>
    %10 = arith.addf %4, %9 : vector<256x4xf32>
    %c0_10 = arith.constant 0 : index
    %c32 = arith.constant 32 : index
    %c0_11 = arith.constant 0 : index
    %11 = vector.load %arg2[%c0_10, %c32, %c0_11] : memref<1x304x16xbf16, #tpu.memory_space<vmem>>, vector<1x256x16xbf16>
    %12 = vector.shape_cast %11 : vector<1x256x16xbf16> to vector<256x16xbf16>
    %c2 = arith.constant 2 : index
    %c0_12 = arith.constant 0 : index
    %c0_13 = arith.constant 0 : index
    %13 = vector.load %arg3[%c2, %c0_12, %c0_13] : memref<4x16x4xbf16, #tpu.memory_space<vmem>>, vector<1x16x4xbf16>
    %14 = vector.shape_cast %13 : vector<1x16x4xbf16> to vector<16x4xbf16>
    %cst_14 = arith.constant dense<0.000000e+00> : vector<256x4xf32>
    %15 = tpu.matmul %12, %14, %cst_14 {dimension_numbers = #tpu.dot_dimension_numbers<[1], [0], [0], [1], [0, 0, 1, 1], [], []>} : vector<256x16xbf16>, vector<16x4xbf16>, vector<256x4xf32> -> vector<256x4xf32>
    %16 = arith.addf %10, %15 : vector<256x4xf32>
    %c0_15 = arith.constant 0 : index
    %c48 = arith.constant 48 : index
    %c0_16 = arith.constant 0 : index
    %17 = vector.load %arg2[%c0_15, %c48, %c0_16] : memref<1x304x16xbf16, #tpu.memory_space<vmem>>, vector<1x256x16xbf16>
    %18 = vector.shape_cast %17 : vector<1x256x16xbf16> to vector<256x16xbf16>
    %c3 = arith.constant 3 : index
    %c0_17 = arith.constant 0 : index
    %c0_18 = arith.constant 0 : index
    %19 = vector.load %arg3[%c3, %c0_17, %c0_18] : memref<4x16x4xbf16, #tpu.memory_space<vmem>>, vector<1x16x4xbf16>
    %20 = vector.shape_cast %19 : vector<1x16x4xbf16> to vector<16x4xbf16>
    %cst_19 = arith.constant dense<0.000000e+00> : vector<256x4xf32>
    %21 = tpu.matmul %18, %20, %cst_19 {dimension_numbers = #tpu.dot_dimension_numbers<[1], [0], [0], [1], [0, 0, 1, 1], [], []>} : vector<256x16xbf16>, vector<16x4xbf16>, vector<256x4xf32> -> vector<256x4xf32>
    %22 = arith.addf %16, %21 : vector<256x4xf32>
    %cst_20 = arith.constant dense<0.000000e+00> : vector<4xf32>
    %23 = vector.multi_reduction <add>, %22, %cst_20 [0] : vector<256x4xf32> to vector<4xf32>
    %24 = vector.shape_cast %23 : vector<4xf32> to vector<1x4xf32>
    %cst_21 = arith.constant 3.906250e-03 : f32
    %25 = vector.broadcast %cst_21 : f32 to vector<1x4xf32>
    %26 = arith.mulf %24, %25 : vector<1x4xf32>
    %27 = arith.mulf %22, %22 : vector<256x4xf32>
    %cst_22 = arith.constant dense<0.000000e+00> : vector<4xf32>
    %28 = vector.multi_reduction <add>, %27, %cst_22 [0] : vector<256x4xf32> to vector<4xf32>
    %29 = vector.shape_cast %28 : vector<4xf32> to vector<1x4xf32>
    %cst_23 = arith.constant 3.906250e-03 : f32
    %30 = vector.broadcast %cst_23 : f32 to vector<1x4xf32>
    %31 = arith.mulf %29, %30 : vector<1x4xf32>
    %32 = arith.mulf %26, %26 : vector<1x4xf32>
    %33 = arith.subf %31, %32 : vector<1x4xf32>
    %cst_24 = arith.constant 0.000000e+00 : f32
    %34 = vector.broadcast %cst_24 : f32 to vector<1x4xf32>
    %35 = arith.maximumf %33, %34 : vector<1x4xf32>
    %cst_25 = arith.constant 9.99999974E-6 : f32
    %36 = vector.broadcast %cst_25 : f32 to vector<1x4xf32>
    %37 = arith.addf %35, %36 : vector<1x4xf32>
    %38 = math.rsqrt %37 : vector<1x4xf32>
    %39 = vector.broadcast %26 : vector<1x4xf32> to vector<256x4xf32>
    %40 = arith.subf %22, %39 : vector<256x4xf32>
    %41 = vector.broadcast %38 : vector<1x4xf32> to vector<256x4xf32>
    %42 = arith.mulf %40, %41 : vector<256x4xf32>
    %cst_26 = arith.constant 2.000000e-01 : f32
    %43 = vector.broadcast %cst_26 : f32 to vector<256x4xf32>
    %44 = arith.mulf %43, %42 : vector<256x4xf32>
    %45 = arith.maximumf %42, %44 : vector<256x4xf32>
    %46 = arith.truncf %45 : vector<256x4xf32> to vector<256x4xbf16>
    %c0_27 = arith.constant 0 : index
    %c0_28 = arith.constant 0 : index
    %c0_29 = arith.constant 0 : index
    %c0_30 = arith.constant 0 : index
    %47 = vector.load %arg4[%c0_27, %c0_28, %c0_29, %c0_30] : memref<1x2x256x4xbf16, #tpu.memory_space<vmem>>, vector<1x1x256x4xbf16>
    %48 = vector.shape_cast %47 : vector<1x1x256x4xbf16> to vector<256x4xbf16>
    %49 = vector.shape_cast %46 : vector<256x4xbf16> to vector<1x1x256x4xbf16>
    tpu.vector_store %arg4[%c0_27, %c0_28, %c0_29, %c0_30], %49 {strides = array<i32>} : memref<1x2x256x4xbf16, #tpu.memory_space<vmem>>, vector<1x1x256x4xbf16>,
    %50 = arith.truncf %22 : vector<256x4xf32> to vector<256x4xbf16>
    %c0_31 = arith.constant 0 : index
    %c1_32 = arith.constant 1 : index
    %c0_33 = arith.constant 0 : index
    %c0_34 = arith.constant 0 : index
    %51 = vector.load %arg4[%c0_31, %c1_32, %c0_33, %c0_34] : memref<1x2x256x4xbf16, #tpu.memory_space<vmem>>, vector<1x1x256x4xbf16>
    %52 = vector.shape_cast %51 : vector<1x1x256x4xbf16> to vector<256x4xbf16>
    %53 = vector.shape_cast %50 : vector<256x4xbf16> to vector<1x1x256x4xbf16>
    tpu.vector_store %arg4[%c0_31, %c1_32, %c0_33, %c0_34], %53 {strides = array<i32>} : memref<1x2x256x4xbf16, #tpu.memory_space<vmem>>, vector<1x1x256x4xbf16>,
    return
  }
  func.func @transform_0(%arg0: i32, %arg1: i32) -> (i32, i32, i32) {
    %c0_i32 = arith.constant 0 : i32
    %c0_i32_0 = arith.constant 0 : i32
    %c0_i32_1 = arith.constant 0 : i32
    return %arg0, %c0_i32, %c0_i32_0 : i32, i32, i32
  }
  func.func @transform_1(%arg0: i32, %arg1: i32) -> (i32, i32, i32) {
    %c0_i32 = arith.constant 0 : i32
    %c0_i32_0 = arith.constant 0 : i32
    %c0_i32_1 = arith.constant 0 : i32
    return %c0_i32, %c0_i32_0, %arg1 : i32, i32, i32
  }
  func.func @transform_2(%arg0: i32, %arg1: i32) -> (i32, i32, i32, i32) {
    %c0_i32 = arith.constant 0 : i32
    %c0_i32_0 = arith.constant 0 : i32
    %c0_i32_1 = arith.constant 0 : i32
    return %arg0, %c0_i32, %c0_i32_0, %arg1 : i32, i32, i32, i32
  }
}

</mosaic_0001>

<bundles_post_ra>
// kernel: unet_mid2d_forward.1
= control target key start
LH: loop header
LB: loop body
LE: loop exit
PB: predicated region body
PF: predicated region fallthrough
CT: control target
= control target key end

     0   :  { %s2851_s9 = smov 0   ;;  %s2853_s10 = smov 0   ;;  %s3697_s0 = inlined_call_operand.vmem [shape: bf16[2,304,16], index: 0, kind: input, shape index: {}]   ;;  %s3698_s1 = inlined_call_operand.vmem [shape: bf16[4,16,4], index: 1, kind: input, shape index: {}]   ;;  %s3699_s2 = inlined_call_operand.vmem [shape: bf16[2,2,256,4], index: 2, kind: output, shape index: {}]  }
   0x1   :  { %s2855_s11 = smov 0  }
   0x2 LB: > { %s24_s12 = sadd.s32 1, %s2830_s10  ;;  %p2142_p0 = scmp.ge.s32.totalorder %s2834_s11, 1  ;;  %s2834_s11 = sphi %s2855_s11, %s12_s11   ;;  %s2830_s10 = sphi %s2853_s10, %s3705_s10   ;;  %s2826_s9 = sphi %s2851_s9, %s3704_s9  }
   0x3   : > { %p26_p1 = scmp.ge.s32.totalorder %s24_s12, 2  ;;  %p135_p2 = scmp.lt.s32.totalorder %s2834_s11, 3 }
   0x5   : > { %s3707_s12 = smov (%p26_p1, %s24_s12), 0  ;;  %p136_p3 = pnand %p2142_p0, %p135_p2 }
   0x7   : > { %139 = sbr.rel (%p136_p3) target bundleno = 442 (0x1ba), region = 28 }
   0xe   : > { %v2757_v0 = vld [vmem:[%s3698_s1 + $0x8] sm:$0xff]   ;;  %p164_p4 = scmp.lt.s32.totalorder %s2826_s9, 1  ;;  %v2758_v1 = vld [vmem:[%s3698_s1 + $0x10] sm:$0xff]   ;;  %v2760_v2 = vld [vmem:[%s3698_s1] sm:$0xff]   ;;  %vm307_vm0 = vcmask 130048   ;;  %vm1850_vm1 = vcmask 27648  }
   0xf   : > { %2500 = vmatprep.subr.bf16.mxu1 %v2757_v0  ;;  %2568 = vmatprep.subr.bf16.mxu0 %v2758_v1  ;;  %v2762_v3 = vld [vmem:[%s3698_s1 + $0x18] sm:$0xff]   ;;  %vm1416_vm2 = vcmask 31744  }
  0x10   : > { %s3709_s9 = smov (!%p164_p4, %s2826_s9), 1  ;;  %2501 = vmatpush3.bf16.msra.mxu1 %v2757_v0  ;;  %2569 = vmatpush3.bf16.msra.mxu0 %v2758_v1 }
  0x11   : > { %s2732_s21 = smul.u32 152, %s3709_s9  ;;  %2534 = vmatprep.subr.bf16.mxu1 %v2760_v2  ;;  %2602 = vmatprep.subr.bf16.mxu0 %v2762_v3  ;;  %s2367_s25 = sshll.u32 %s3709_s9, 8 }
  0x12   : > { %s3040_s28 = scalar_lea.vmem %s3699_s2, %s2367_s25 }
  0x13   : > { %s2887_s24 = scalar_lea.vmem %s3697_s0, %s2732_s21 }
  0x14   : > { %v2890_v4 = vld [vmem:[%s2887_s24 + $0x8] sm:$0xff]   ;;  %v2761_v5 = vld [vmem:[%s2887_s24 + $0x10] sm:$0xff]   ;;  %v2764_v7 = vld [vmem:[%s2887_s24 + $0x18] sm:$0xff]  }
  0x15   : > { %2502 = vmatprep.mubr.msk.bf16.mxu1 %vm307_vm0, %v2890_v4  ;;  %v2896_v6 = vld [vmem:[%s2887_s24 + $0x10] sm:$0xff]   ;;  %2570 = vmatprep.mubr.msk.bf16.mxu0 %vm307_vm0, %v2761_v5  ;;  %v2903_v8 = vld [vmem:[%s2887_s24 + $0x18] sm:$0xff]   ;;  %v2766_v9 = vld [vmem:[%s2887_s24 + $0x20] sm:$0xff]  }
  0x16   : > { %2503 = vmatmul.mubr.msk.bf16.vlgmr.msra.gmra.mrb[0].mxu1 %vm307_vm0, %v2896_v6  ;;  %2571 = vmatmul.mubr.msk.bf16.vlgmr.msra.gmra.mrb[0].mxu0 %vm307_vm0, %v2764_v7  ;;  %v2911_v10 = vld [vmem:[%s2887_s24 + $0x20] sm:$0xff]   ;;  %v2768_v11 = vld [vmem:[%s2887_s24 + $0x28] sm:$0xff]   ;;  %v2770_v13 = vld [vmem:[%s2887_s24 + $0x30] sm:$0xff]  }
  0x17   : > { %2535 = vmatpush3.bf16.msra.mxu1 %v2760_v2  ;;  %2603 = vmatpush3.bf16.msra.mxu0 %v2762_v3  ;;  %v2915_v12 = vld [vmem:[%s2887_s24 + $0x28] sm:$0xff]   ;;  %v2925_v14 = vld [vmem:[%s2887_s24 + $0x30] sm:$0xff]   ;;  %v2772_v15 = vld [vmem:[%s2887_s24 + $0x38] sm:$0xff]  }
  0x18   : > { %2506 = vmatprep.mubr.msk.bf16.mxu1 %vm307_vm0, %v2903_v8  ;;  %2574 = vmatprep.mubr.msk.bf16.mxu0 %vm307_vm0, %v2766_v9  ;;  %v2929_v16 = vld [vmem:[%s2887_s24 + $0x38] sm:$0xff]   ;;  %v2774_v17 = vld [vmem:[%s2887_s24 + $0x40] sm:$0xff]   ;;  %v2776_v19 = vld [vmem:[%s2887_s24 + $0x48] sm:$0xff]  }
  0x19   : > { %v2775_v18 = vld [vmem:[%s2887_s24 + $0x40] sm:$0xff]   ;;  %v2941_v20 = vld [vmem:[%s2887_s24 + $0x48] sm:$0xff]   ;;  %v2778_v21 = vld [vmem:[%s2887_s24 + $0x50] sm:$0xff]  }
  0x1a   : > { %v2779_v22 = vld [vmem:[%s2887_s24 + $0x50] sm:$0xff]   ;;  %v2780_v23 = vld [vmem:[%s2887_s24 + $0x58] sm:$0xff]   ;;  %v2782_v25 = vld [vmem:[%s2887_s24 + $0x60] sm:$0xff]  }
  0x1b   : > { %v2781_v24 = vld [vmem:[%s2887_s24 + $0x58] sm:$0xff]   ;;  %v2783_v26 = vld [vmem:[%s2887_s24 + $0x60] sm:$0xff]   ;;  %v2784_v27 = vld [vmem:[%s2887_s24 + $0x68] sm:$0xff]  }
  0x1c   : > { %v2785_v28 = vld [vmem:[%s2887_s24 + $0x68] sm:$0xff]   ;;  %v2786_v29 = vld [vmem:[%s2887_s24 + $0x70] sm:$0xff]   ;;  %v2788_v31 = vld [vmem:[%s2887_s24 + $0x78] sm:$0xff]  }
  0x1d   : > { %v2787_v30 = vld [vmem:[%s2887_s24 + $0x70] sm:$0xff]   ;;  %v2789_v32 = vld [vmem:[%s2887_s24 + $0x78] sm:$0xff]   ;;  %v2790_v33 = vld [vmem:[%s2887_s24 + $0x80] sm:$0xff]  }
  0x1e   : > { %2507 = vmatmul.mubr.msk.bf16.gmra.mrb[4].mxu1 %vm307_vm0, %v2911_v10  ;;  %2575 = vmatmul.mubr.msk.bf16.gmra.mrb[4].mxu0 %vm307_vm0, %v2768_v11  ;;  %v2791_v34 = vld [vmem:[%s2887_s24 + $0x80] sm:$0xff]   ;;  %v2792_v35 = vld [vmem:[%s2887_s24 + $0x88] sm:$0xff]   ;;  %v2794_v37 = vld [vmem:[%s2887_s24 + $0x18] sm:$0xff]  }
  0x1f   : > { %2510 = vmatprep.mubr.msk.bf16.mxu1 %vm307_vm0, %v2915_v12  ;;  %2578 = vmatprep.mubr.msk.bf16.mxu0 %vm307_vm0, %v2770_v13  ;;  %v2793_v36 = vld [vmem:[%s2887_s24] sm:$0xff]   ;;  %v2796_v39 = vld [vmem:[%s2887_s24 + $0x28] sm:$0xff]   ;;  %v2797_v40 = vld [vmem:[%s2887_s24 + $0x30] sm:$0xff]  }
  0x20   : > { %v2795_v38 = vld [vmem:[%s2887_s24 + $0x20] sm:$0xff]   ;;  %v2798_v41 = vld [vmem:[%s2887_s24 + $0x38] sm:$0xff]   ;;  %v2800_v43 = vld [vmem:[%s2887_s24 + $0x48] sm:$0xff]  }
  0x21   : > { %v2799_v42 = vld [vmem:[%s2887_s24 + $0x40] sm:$0xff]   ;;  %v2801_v44 = vld [vmem:[%s2887_s24 + $0x50] sm:$0xff]   ;;  %v2802_v45 = vld [vmem:[%s2887_s24 + $0x58] sm:$0xff]  }
  0x22   : > { %v2803_v46 = vld [vmem:[%s2887_s24 + $0x60] sm:$0xff]   ;;  %v2804_v47 = vld [vmem:[%s2887_s24 + $0x68] sm:$0xff]   ;;  %v2805_v48 = vld [vmem:[%s2887_s24 + $0x70] sm:$0xff]  }
  0x23   : > { %v2806_v49 = vld [vmem:[%s2887_s24 + $0x78] sm:$0xff]   ;;  %v2807_v50 = vld [vmem:[%s2887_s24 + $0x80] sm:$0xff]   ;;  %v2808_v51 = vld [vmem:[%s2887_s24 + $0x88] sm:$0xff]  }
  0x24   : > { %v2809_v52 = vld [vmem:[%s2887_s24 + $0x90] sm:$0xff]  }
  0x26   : > { %2511 = vmatmul.mubr.msk.bf16.gmra.mrb[8].mxu1 %vm307_vm0, %v2925_v14  ;;  %2579 = vmatmul.mubr.msk.bf16.gmra.mrb[8].mxu0 %vm307_vm0, %v2772_v15 }
  0x27   : > { %2514 = vmatprep.mubr.msk.bf16.mxu1 %vm307_vm0, %v2929_v16  ;;  %2582 = vmatprep.mubr.msk.bf16.mxu0 %vm307_vm0, %v2774_v17 }
  0x2e   : > { %2515 = vmatmul.mubr.msk.bf16.gmra.mrb[12].mxu1 %vm307_vm0, %v2775_v18  ;;  %2583 = vmatmul.mubr.msk.bf16.gmra.mrb[12].mxu0 %vm307_vm0, %v2776_v19 }
  0x2f   : > { %2518 = vmatprep.mubr.msk.bf16.mxu1 %vm307_vm0, %v2941_v20  ;;  %2586 = vmatprep.mubr.msk.bf16.mxu0 %vm307_vm0, %v2778_v21 }
  0x36   : > { %2519 = vmatmul.mubr.msk.bf16.gmra.mrb[16].mxu1 %vm307_vm0, %v2779_v22  ;;  %2587 = vmatmul.mubr.msk.bf16.gmra.mrb[16].mxu0 %vm307_vm0, %v2780_v23 }
  0x37   : > { %2522 = vmatprep.mubr.msk.bf16.mxu1 %vm307_vm0, %v2781_v24  ;;  %2590 = vmatprep.mubr.msk.bf16.mxu0 %vm307_vm0, %v2782_v25 }
  0x3e   : > { %2523 = vmatmul.mubr.msk.bf16.gmra.mrb[20].mxu1 %vm307_vm0, %v2783_v26  ;;  %2591 = vmatmul.mubr.msk.bf16.gmra.mrb[20].mxu0 %vm307_vm0, %v2784_v27 }
  0x3f   : > { %2526 = vmatprep.mubr.msk.bf16.mxu1 %vm307_vm0, %v2785_v28  ;;  %2594 = vmatprep.mubr.msk.bf16.mxu0 %vm307_vm0, %v2786_v29 }
  0x46   : > { %2527 = vmatmul.mubr.msk.bf16.gmra.mrb[24].mxu1 %vm307_vm0, %v2787_v30  ;;  %2595 = vmatmul.mubr.msk.bf16.gmra.mrb[24].mxu0 %vm307_vm0, %v2788_v31 }
  0x47   : > { %2530 = vmatprep.mubr.msk.bf16.mxu1 %vm307_vm0, %v2789_v32  ;;  %2598 = vmatprep.mubr.msk.bf16.mxu0 %vm307_vm0, %v2790_v33 }
  0x4e   : > { %2531 = vmatmul.mubr.msk.bf16.gmra.mrb[28].mxu1 %vm307_vm0, %v2791_v34  ;;  %2599 = vmatmul.mubr.msk.bf16.gmra.mrb[28].mxu0 %vm307_vm0, %v2792_v35 }
  0x4f   : > { %2536 = vmatprep.mubr.msk.bf16.mxu1 %vm307_vm0, %v2793_v36  ;;  %2604 = vmatprep.mubr.msk.bf16.mxu0 %vm307_vm0, %v2794_v37 }
  0x56   : > { %2537 = vmatmul.mubr.msk.bf16.vlgmr.msra.gmra.mrb[0].mxu1 %vm307_vm0, %v2890_v4  ;;  %2605 = vmatmul.mubr.msk.bf16.vlgmr.msra.gmra.mrb[0].mxu0 %vm307_vm0, %v2795_v38 }
  0x57   : > { %2540 = vmatprep.mubr.msk.bf16.mxu1 %vm307_vm0, %v2896_v6  ;;  %2608 = vmatprep.mubr.msk.bf16.mxu0 %vm307_vm0, %v2796_v39 }
  0x5e   : > { %2541 = vmatmul.mubr.msk.bf16.gmra.mrb[4].mxu1 %vm307_vm0, %v2903_v8  ;;  %2609 = vmatmul.mubr.msk.bf16.gmra.mrb[4].mxu0 %vm307_vm0, %v2797_v40 }
  0x5f   : > { %2544 = vmatprep.mubr.msk.bf16.mxu1 %vm307_vm0, %v2911_v10  ;;  %2612 = vmatprep.mubr.msk.bf16.mxu0 %vm307_vm0, %v2798_v41 }
  0x66   : > { %2545 = vmatmul.mubr.msk.bf16.gmra.mrb[8].mxu1 %vm307_vm0, %v2915_v12  ;;  %2613 = vmatmul.mubr.msk.bf16.gmra.mrb[8].mxu0 %vm307_vm0, %v2799_v42 }
  0x67   : > { %2548 = vmatprep.mubr.msk.bf16.mxu1 %vm307_vm0, %v2925_v14  ;;  %2616 = vmatprep.mubr.msk.bf16.mxu0 %vm307_vm0, %v2800_v43 }
  0x6e   : > { %2549 = vmatmul.mubr.msk.bf16.gmra.mrb[12].mxu1 %vm307_vm0, %v2929_v16  ;;  %2617 = vmatmul.mubr.msk.bf16.gmra.mrb[12].mxu0 %vm307_vm0, %v2801_v44 }
  0x6f   : > { %2552 = vmatprep.mubr.msk.bf16.mxu1 %vm307_vm0, %v2775_v18  ;;  %2620 = vmatprep.mubr.msk.bf16.mxu0 %vm307_vm0, %v2802_v45 }
  0x76   : > { %2553 = vmatmul.mubr.msk.bf16.gmra.mrb[16].mxu1 %vm307_vm0, %v2941_v20  ;;  %2621 = vmatmul.mubr.msk.bf16.gmra.mrb[16].mxu0 %vm307_vm0, %v2803_v46 }
  0x77   : > { %2556 = vmatprep.mubr.msk.bf16.mxu1 %vm307_vm0, %v2779_v22  ;;  %2624 = vmatprep.mubr.msk.bf16.mxu0 %vm307_vm0, %v2804_v47 }
  0x7e   : > { %2557 = vmatmul.mubr.msk.bf16.gmra.mrb[20].mxu1 %vm307_vm0, %v2781_v24  ;;  %2625 = vmatmul.mubr.msk.bf16.gmra.mrb[20].mxu0 %vm307_vm0, %v2805_v48 }
  0x7f   : > { %2560 = vmatprep.mubr.msk.bf16.mxu1 %vm307_vm0, %v2783_v26  ;;  %2628 = vmatprep.mubr.msk.bf16.mxu0 %vm307_vm0, %v2806_v49 }
  0x86   : > { %2561 = vmatmul.mubr.msk.bf16.gmra.mrb[24].mxu1 %vm307_vm0, %v2785_v28  ;;  %2629 = vmatmul.mubr.msk.bf16.gmra.mrb[24].mxu0 %vm307_vm0, %v2807_v50 }
  0x87   : > { %2564 = vmatprep.mubr.msk.bf16.mxu1 %vm307_vm0, %v2787_v30  ;;  %2632 = vmatprep.mubr.msk.bf16.mxu0 %vm307_vm0, %v2808_v51 }
  0x8e   : > { %2565 = vmatmul.mubr.msk.bf16.gmra.mrb[28].mxu1 %vm307_vm0, %v2789_v32  ;;  %2633 = vmatmul.mubr.msk.bf16.gmra.mrb[28].mxu0 %vm307_vm0, %v2809_v52 }
 0x129   : > { %v2538_v53 = vpop.f32.mrb[0].mxu1  ;;  %v2606_v54 = vpop.f32.mrb[0].mxu0 }
 0x12a   : > { %v565_v55 = vpop.f32.mrb[1].mxu1  ;;  %v3035_v56 = vadd.f32 %v2606_v54, %v2538_v53  ;;  %v1257_v57 = vpop.f32.mrb[1].mxu0 }
 0x12b   : > { %v2539_v58 = vpop.f32.mrb[2].mxu1  ;;  %v3042_v59 = vadd.f32 %v1257_v57, %v565_v55  ;;  %v2607_v60 = vpop.f32.mrb[2].mxu0 }
 0x12c   : > { %v568_v61 = vpop.f32.mrb[3].mxu1  ;;  %v2402_v62 = vpack.c.bf16 %v3035_v56, %v3035_v56  ;;  %v3046_v63 = vadd.f32 %v2607_v60, %v2539_v58  ;;  %v1260_v0 = vpop.f32.mrb[3].mxu0  ;;  %v1489_v4 = vmul.f32 %v3035_v56, %v3035_v56  ;;  %v1420_v13 = vsel %vm1416_vm2, %v3035_v56, 0.0 }
 0x12d   : > { %v1487_v1 = vmul.f32 %v3042_v59, %v3042_v59  ;;  %v2400_v2 = vpack.c.bf16 %v3042_v59, %v3042_v59  ;;  %v3052_v3 = vadd.f32 %v1260_v0, %v568_v61  ;;  %v1417_v6 = vsel %vm1416_vm2, %v3042_v59, 0.0 }
 0x12e   : > { %2335 = vst.msk [vmem:[%s3040_s28 + $0x88] sm:$0xf] %vm1850_vm1, %v2402_v62  ;;  %v2403_v5 = vpack.c.bf16 %v3046_v63, %v3046_v63  ;;  %v1490_v10 = vmul.f32 %v3046_v63, %v3046_v63  ;;  %v1522_v23 = vsel %vm1416_vm2, %v1489_v4, 0.0  ;;  %v1422_v27 = vsel %vm1416_vm2, %v3046_v63, 0.0 }
 0x12f   : > { %2333 = vst.msk [vmem:[%s3040_s28 + $0x80] sm:$0xf] %vm1850_vm1, %v2400_v2  ;;  %v1418_v7 = vsel %vm1416_vm2, %v3052_v3, 0.0  ;;  %v1488_v8 = vmul.f32 %v3052_v3, %v3052_v3  ;;  %v2401_v9 = vpack.c.bf16 %v3052_v3, %v3052_v3  ;;  %v1519_v14 = vsel %vm1416_vm2, %v1487_v1, 0.0 }
 0x130   : > { %2336 = vst.msk [vmem:[%s3040_s28 + $0x8c] sm:$0xf] %vm1850_vm1, %v2403_v5  ;;  %v1419_v11 = vadd.f32 %v1418_v7, %v1417_v6  ;;  %v1524_v28 = vsel %vm1416_vm2, %v1490_v10, 0.0 }
 0x131   : > { %v2542_v12 = vpop.f32.mrb[4].mxu1  ;;  %v1520_v15 = vsel %vm1416_vm2, %v1488_v8, 0.0  ;;  %2334 = vst.msk [vmem:[%s3040_s28 + $0x84] sm:$0xf] %vm1850_vm1, %v2401_v9  ;;  %v2610_v16 = vpop.f32.mrb[4].mxu0 }
 0x132   : > { %v581_v17 = vpop.f32.mrb[5].mxu1  ;;  %v1421_v18 = vadd.f32 %v1420_v13, %v1419_v11  ;;  %v1521_v19 = vadd.f32 %v1520_v15, %v1519_v14  ;;  %v3080_v20 = vadd.f32 %v2610_v16, %v2542_v12  ;;  %v1273_v21 = vpop.f32.mrb[5].mxu0 }
 0x133   : > { %v2543_v22 = vpop.f32.mrb[6].mxu1  ;;  %v3083_v24 = vadd.f32 %v1273_v21, %v581_v17  ;;  %v2611_v25 = vpop.f32.mrb[6].mxu0 }
 0x134   : > { %v584_v26 = vpop.f32.mrb[7].mxu1  ;;  %v1523_v29 = vadd.f32 %v1522_v23, %v1521_v19  ;;  %v2406_v30 = vpack.c.bf16 %v3080_v20, %v3080_v20  ;;  %v1276_v31 = vpop.f32.mrb[7].mxu0  ;;  %v1423_v32 = vadd.f32 %v1422_v27, %v1421_v18  ;;  %v3098_v37 = vadd.f32 %v2611_v25, %v2543_v22 }
 0x135   : > { %v1424_v33 = vsel %vm1416_vm2, %v3083_v24, 0.0  ;;  %v1491_v34 = vmul.f32 %v3083_v24, %v3083_v24  ;;  %v2404_v35 = vpack.c.bf16 %v3083_v24, %v3083_v24  ;;  %v3100_v38 = vadd.f32 %v1276_v31, %v584_v26 }
 0x136   : > { %2339 = vst.msk [vmem:[%s3040_s28 + $0x98] sm:$0xf] %vm1850_vm1, %v2406_v30  ;;  %v1525_v36 = vadd.f32 %v1524_v28, %v1523_v29  ;;  %v1425_v39 = vadd.f32 %v1424_v33, %v1423_v32  ;;  %v1493_v41 = vmul.f32 %v3080_v20, %v3080_v20  ;;  %v2407_v43 = vpack.c.bf16 %v3098_v37, %v3098_v37 }
 0x137   : > { %v1526_v40 = vsel %vm1416_vm2, %v1491_v34, 0.0  ;;  %2337 = vst.msk [vmem:[%s3040_s28 + $0x90] sm:$0xf] %vm1850_vm1, %v2404_v35  ;;  %v1426_v45 = vsel %vm1416_vm2, %v3100_v38, 0.0  ;;  %v1492_v46 = vmul.f32 %v3100_v38, %v3100_v38  ;;  %v2405_v47 = vpack.c.bf16 %v3100_v38, %v3100_v38 }
 0x138   : > { %v1527_v42 = vadd.f32 %v1526_v40, %v1525_v36  ;;  %2340 = vst.msk [vmem:[%s3040_s28 + $0x9c] sm:$0xf] %vm1850_vm1, %v2407_v43  ;;  %v1427_v50 = vadd.f32 %v1426_v45, %v1425_v39  ;;  %v1428_v54 = vsel %vm1416_vm2, %v3080_v20, 0.0  ;;  %v1494_v55 = vmul.f32 %v3098_v37, %v3098_v37 }
 0x139   : > { %v2546_v44 = vpop.f32.mrb[8].mxu1  ;;  %v2614_v48 = vpop.f32.mrb[8].mxu0  ;;  %v1528_v57 = vsel %vm1416_vm2, %v1492_v46, 0.0  ;;  %2338 = vst.msk [vmem:[%s3040_s28 + $0x94] sm:$0xf] %vm1850_vm1, %v2405_v47  ;;  %v1530_v62 = vsel %vm1416_vm2, %v1493_v41, 0.0 }
 0x13a   : > { %v597_v49 = vpop.f32.mrb[9].mxu1  ;;  %v3117_v51 = vadd.f32 %v2614_v48, %v2546_v44  ;;  %v1289_v52 = vpop.f32.mrb[9].mxu0  ;;  %v1430_v0 = vsel %vm1416_vm2, %v3098_v37, 0.0  ;;  %v1429_v1 = vadd.f32 %v1428_v54, %v1427_v50  ;;  %v1529_v2 = vadd.f32 %v1528_v57, %v1527_v42 }
 0x13b   : > { %v2547_v53 = vpop.f32.mrb[10].mxu1  ;;  %v3126_v58 = vadd.f32 %v1289_v52, %v597_v49  ;;  %v2615_v60 = vpop.f32.mrb[10].mxu0  ;;  %v1532_v12 = vsel %vm1416_vm2, %v1494_v55, 0.0 }
 0x13c   : > { %v600_v61 = vpop.f32.mrb[11].mxu1  ;;  %v1292_v4 = vpop.f32.mrb[11].mxu0  ;;  %v2410_v5 = vpack.c.bf16 %v3117_v51, %v3117_v51  ;;  %v1531_v9 = vadd.f32 %v1530_v62, %v1529_v2  ;;  %v1431_v10 = vadd.f32 %v1430_v0, %v1429_v1  ;;  %v3139_v11 = vadd.f32 %v2615_v60, %v2547_v53 }
 0x13d   : > { %v1432_v6 = vsel %vm1416_vm2, %v3126_v58, 0.0  ;;  %v1495_v7 = vmul.f32 %v3126_v58, %v3126_v58  ;;  %v2408_v8 = vpack.c.bf16 %v3126_v58, %v3126_v58  ;;  %v3147_v14 = vadd.f32 %v1292_v4, %v600_v61 }
 0x13e   : > { %2343 = vst.msk [vmem:[%s3040_s28 + $0xa8] sm:$0xf] %vm1850_vm1, %v2410_v5  ;;  %v1497_v15 = vmul.f32 %v3117_v51, %v3117_v51  ;;  %v1433_v16 = vadd.f32 %v1432_v6, %v1431_v10  ;;  %v1533_v17 = vadd.f32 %v1532_v12, %v1531_v9  ;;  %v2411_v19 = vpack.c.bf16 %v3139_v11, %v3139_v11 }
 0x13f   : > { %v1534_v13 = vsel %vm1416_vm2, %v1495_v7, 0.0  ;;  %2341 = vst.msk [vmem:[%s3040_s28 + $0xa0] sm:$0xf] %vm1850_vm1, %v2408_v8  ;;  %v1434_v21 = vsel %vm1416_vm2, %v3147_v14, 0.0  ;;  %v1496_v22 = vmul.f32 %v3147_v14, %v3147_v14  ;;  %v2409_v23 = vpack.c.bf16 %v3147_v14, %v3147_v14 }
 0x140   : > { %v1535_v27 = vadd.f32 %v1534_v13, %v1533_v17  ;;  %v1435_v28 = vadd.f32 %v1434_v21, %v1433_v16  ;;  %v1436_v32 = vsel %vm1416_vm2, %v3117_v51, 0.0  ;;  %v1498_v33 = vmul.f32 %v3139_v11, %v3139_v11  ;;  %2344 = vst.msk [vmem:[%s3040_s28 + $0xac] sm:$0xf] %vm1850_vm1, %v2411_v19 }
 0x141   : > { %v2550_v18 = vpop.f32.mrb[12].mxu1  ;;  %v2618_v25 = vpop.f32.mrb[12].mxu0  ;;  %v1536_v34 = vsel %vm1416_vm2, %v1496_v22, 0.0  ;;  %2342 = vst.msk [vmem:[%s3040_s28 + $0xa4] sm:$0xf] %vm1850_vm1, %v2409_v23  ;;  %v1538_v40 = vsel %vm1416_vm2, %v1497_v15, 0.0 }
 0x142   : > { %v613_v26 = vpop.f32.mrb[13].mxu1  ;;  %v3159_v29 = vadd.f32 %v2618_v25, %v2550_v18  ;;  %v1305_v30 = vpop.f32.mrb[13].mxu0  ;;  %v1438_v41 = vsel %vm1416_vm2, %v3139_v11, 0.0  ;;  %v1437_v42 = vadd.f32 %v1436_v32, %v1435_v28  ;;  %v1537_v43 = vadd.f32 %v1536_v34, %v1535_v27 }
 0x143   : > { %v2551_v31 = vpop.f32.mrb[14].mxu1  ;;  %v3170_v35 = vadd.f32 %v1305_v30, %v613_v26  ;;  %v2619_v36 = vpop.f32.mrb[14].mxu0  ;;  %v1540_v53 = vsel %vm1416_vm2, %v1498_v33, 0.0 }
 0x144   : > { %v616_v39 = vpop.f32.mrb[15].mxu1  ;;  %v1308_v44 = vpop.f32.mrb[15].mxu0  ;;  %v2414_v45 = vpack.c.bf16 %v3159_v29, %v3159_v29  ;;  %v1539_v49 = vadd.f32 %v1538_v40, %v1537_v43  ;;  %v1439_v50 = vadd.f32 %v1438_v41, %v1437_v42  ;;  %v3183_v52 = vadd.f32 %v2619_v36, %v2551_v31 }
 0x145   : > { %v1440_v46 = vsel %vm1416_vm2, %v3170_v35, 0.0  ;;  %v1499_v47 = vmul.f32 %v3170_v35, %v3170_v35  ;;  %v2412_v48 = vpack.c.bf16 %v3170_v35, %v3170_v35  ;;  %v3191_v55 = vadd.f32 %v1308_v44, %v616_v39 }
 0x146   : > { %2347 = vst.msk [vmem:[%s3040_s28 + $0xb8] sm:$0xf] %vm1850_vm1, %v2414_v45  ;;  %v1501_v57 = vmul.f32 %v3159_v29, %v3159_v29  ;;  %v1441_v60 = vadd.f32 %v1440_v46, %v1439_v50  ;;  %v1541_v61 = vadd.f32 %v1540_v53, %v1539_v49  ;;  %v2415_v0 = vpack.c.bf16 %v3183_v52, %v3183_v52 }
 0x147   : > { %v1542_v54 = vsel %vm1416_vm2, %v1499_v47, 0.0  ;;  %2345 = vst.msk [vmem:[%s3040_s28 + $0xb0] sm:$0xf] %vm1850_vm1, %v2412_v48  ;;  %v1442_v1 = vsel %vm1416_vm2, %v3191_v55, 0.0  ;;  %v1500_v2 = vmul.f32 %v3191_v55, %v3191_v55  ;;  %v2413_v4 = vpack.c.bf16 %v3191_v55, %v3191_v55 }
 0x148   : > { %v1543_v7 = vadd.f32 %v1542_v54, %v1541_v61  ;;  %v1443_v8 = vadd.f32 %v1442_v1, %v1441_v60  ;;  %v1444_v13 = vsel %vm1416_vm2, %v3159_v29, 0.0  ;;  %v1502_v15 = vmul.f32 %v3183_v52, %v3183_v52  ;;  %2348 = vst.msk [vmem:[%s3040_s28 + $0xbc] sm:$0xf] %vm1850_vm1, %v2415_v0 }
 0x149   : > { %v2554_v62 = vpop.f32.mrb[16].mxu1  ;;  %v2622_v5 = vpop.f32.mrb[16].mxu0  ;;  %v1544_v16 = vsel %vm1416_vm2, %v1500_v2, 0.0  ;;  %2346 = vst.msk [vmem:[%s3040_s28 + $0xb4] sm:$0xf] %vm1850_vm1, %v2413_v4  ;;  %v1546_v21 = vsel %vm1416_vm2, %v1501_v57, 0.0 }
 0x14a   : > { %v629_v6 = vpop.f32.mrb[17].mxu1  ;;  %v3203_v9 = vadd.f32 %v2622_v5, %v2554_v62  ;;  %v1321_v10 = vpop.f32.mrb[17].mxu0  ;;  %v1446_v22 = vsel %vm1416_vm2, %v3183_v52, 0.0  ;;  %v1445_v23 = vadd.f32 %v1444_v13, %v1443_v8  ;;  %v1545_v25 = vadd.f32 %v1544_v16, %v1543_v7 }
 0x14b   : > { %v2555_v12 = vpop.f32.mrb[18].mxu1  ;;  %v3214_v17 = vadd.f32 %v1321_v10, %v629_v6  ;;  %v2623_v18 = vpop.f32.mrb[18].mxu0  ;;  %v1548_v36 = vsel %vm1416_vm2, %v1502_v15, 0.0 }
 0x14c   : > { %v632_v19 = vpop.f32.mrb[19].mxu1  ;;  %v1324_v26 = vpop.f32.mrb[19].mxu0  ;;  %v2418_v27 = vpack.c.bf16 %v3203_v9, %v3203_v9  ;;  %v1547_v32 = vadd.f32 %v1546_v21, %v1545_v25  ;;  %v1447_v33 = vadd.f32 %v1446_v22, %v1445_v23  ;;  %v3227_v34 = vadd.f32 %v2623_v18, %v2555_v12 }
 0x14d   : > { %v1448_v28 = vsel %vm1416_vm2, %v3214_v17, 0.0  ;;  %v1503_v30 = vmul.f32 %v3214_v17, %v3214_v17  ;;  %v2416_v31 = vpack.c.bf16 %v3214_v17, %v3214_v17  ;;  %v3235_v40 = vadd.f32 %v1324_v26, %v632_v19 }
 0x14e   : > { %2351 = vst.msk [vmem:[%s3040_s28 + $0xc8] sm:$0xf] %vm1850_vm1, %v2418_v27  ;;  %v1505_v41 = vmul.f32 %v3203_v9, %v3203_v9  ;;  %v1449_v42 = vadd.f32 %v1448_v28, %v1447_v33  ;;  %v1549_v43 = vadd.f32 %v1548_v36, %v1547_v32  ;;  %v2419_v45 = vpack.c.bf16 %v3227_v34, %v3227_v34 }
 0x14f   : > { %v1550_v39 = vsel %vm1416_vm2, %v1503_v30, 0.0  ;;  %2349 = vst.msk [vmem:[%s3040_s28 + $0xc0] sm:$0xf] %vm1850_vm1, %v2416_v31  ;;  %v1450_v46 = vsel %vm1416_vm2, %v3235_v40, 0.0  ;;  %v1504_v47 = vmul.f32 %v3235_v40, %v3235_v40  ;;  %v2417_v48 = vpack.c.bf16 %v3235_v40, %v3235_v40 }
 0x150   : > { %v1551_v53 = vadd.f32 %v1550_v39, %v1549_v43  ;;  %v1451_v54 = vadd.f32 %v1450_v46, %v1449_v42  ;;  %v1452_v62 = vsel %vm1416_vm2, %v3203_v9, 0.0  ;;  %v1506_v0 = vmul.f32 %v3227_v34, %v3227_v34  ;;  %2352 = vst.msk [vmem:[%s3040_s28 + $0xcc] sm:$0xf] %vm1850_vm1, %v2419_v45 }
 0x151   : > { %v2558_v44 = vpop.f32.mrb[20].mxu1  ;;  %v2626_v49 = vpop.f32.mrb[20].mxu0  ;;  %v1552_v1 = vsel %vm1416_vm2, %v1504_v47, 0.0  ;;  %2350 = vst.msk [vmem:[%s3040_s28 + $0xc4] sm:$0xf] %vm1850_vm1, %v2417_v48  ;;  %v1554_v6 = vsel %vm1416_vm2, %v1505_v41, 0.0 }
 0x152   : > { %v645_v50 = vpop.f32.mrb[21].mxu1  ;;  %v3247_v57 = vadd.f32 %v2626_v49, %v2558_v44  ;;  %v1337_v60 = vpop.f32.mrb[21].mxu0  ;;  %v1454_v7 = vsel %vm1416_vm2, %v3227_v34, 0.0  ;;  %v1453_v8 = vadd.f32 %v1452_v62, %v1451_v54  ;;  %v1553_v10 = vadd.f32 %v1552_v1, %v1551_v53 }
 0x153   : > { %v2559_v61 = vpop.f32.mrb[22].mxu1  ;;  %v3258_v2 = vadd.f32 %v1337_v60, %v645_v50  ;;  %v2627_v4 = vpop.f32.mrb[22].mxu0  ;;  %v1556_v23 = vsel %vm1416_vm2, %v1506_v0, 0.0 }
 0x154   : > { %v648_v5 = vpop.f32.mrb[23].mxu1  ;;  %v1340_v12 = vpop.f32.mrb[23].mxu0  ;;  %v2422_v13 = vpack.c.bf16 %v3247_v57, %v3247_v57  ;;  %v1555_v19 = vadd.f32 %v1554_v6, %v1553_v10  ;;  %v1455_v21 = vadd.f32 %v1454_v7, %v1453_v8  ;;  %v3271_v22 = vadd.f32 %v2627_v4, %v2559_v61 }
 0x155   : > { %v1456_v15 = vsel %vm1416_vm2, %v3258_v2, 0.0  ;;  %v1507_v16 = vmul.f32 %v3258_v2, %v3258_v2  ;;  %v2420_v18 = vpack.c.bf16 %v3258_v2, %v3258_v2  ;;  %v3279_v26 = vadd.f32 %v1340_v12, %v648_v5 }
 0x156   : > { %2355 = vst.msk [vmem:[%s3040_s28 + $0xd8] sm:$0xf] %vm1850_vm1, %v2422_v13  ;;  %v1509_v27 = vmul.f32 %v3247_v57, %v3247_v57  ;;  %v1457_v28 = vadd.f32 %v1456_v15, %v1455_v21  ;;  %v1557_v30 = vadd.f32 %v1556_v23, %v1555_v19  ;;  %v2423_v32 = vpack.c.bf16 %v3271_v22, %v3271_v22 }
 0x157   : > { %v1558_v25 = vsel %vm1416_vm2, %v1507_v16, 0.0  ;;  %2353 = vst.msk [vmem:[%s3040_s28 + $0xd0] sm:$0xf] %vm1850_vm1, %v2420_v18  ;;  %v1458_v33 = vsel %vm1416_vm2, %v3279_v26, 0.0  ;;  %v1508_v36 = vmul.f32 %v3279_v26, %v3279_v26  ;;  %v2421_v39 = vpack.c.bf16 %v3279_v26, %v3279_v26 }
 0x158   : > { %v1559_v43 = vadd.f32 %v1558_v25, %v1557_v30  ;;  %v1459_v44 = vadd.f32 %v1458_v33, %v1457_v28  ;;  %v1460_v48 = vsel %vm1416_vm2, %v3247_v57, 0.0  ;;  %v1510_v49 = vmul.f32 %v3271_v22, %v3271_v22  ;;  %2356 = vst.msk [vmem:[%s3040_s28 + $0xdc] sm:$0xf] %vm1850_vm1, %v2423_v32 }
 0x159   : > { %v2562_v31 = vpop.f32.mrb[24].mxu1  ;;  %v2630_v41 = vpop.f32.mrb[24].mxu0  ;;  %v1560_v50 = vsel %vm1416_vm2, %v1508_v36, 0.0  ;;  %2354 = vst.msk [vmem:[%s3040_s28 + $0xd4] sm:$0xf] %vm1850_vm1, %v2421_v39  ;;  %v1562_v61 = vsel %vm1416_vm2, %v1509_v27, 0.0 }
 0x15a   : > { %v661_v42 = vpop.f32.mrb[25].mxu1  ;;  %v3291_v45 = vadd.f32 %v2630_v41, %v2562_v31  ;;  %v1353_v46 = vpop.f32.mrb[25].mxu0  ;;  %v1462_v62 = vsel %vm1416_vm2, %v3271_v22, 0.0  ;;  %v1461_v0 = vadd.f32 %v1460_v48, %v1459_v44  ;;  %v1561_v1 = vadd.f32 %v1560_v50, %v1559_v43 }
 0x15b   : > { %v2563_v47 = vpop.f32.mrb[26].mxu1  ;;  %v3302_v53 = vadd.f32 %v1353_v46, %v661_v42  ;;  %v2631_v54 = vpop.f32.mrb[26].mxu0  ;;  %v1564_v15 = vsel %vm1416_vm2, %v1510_v49, 0.0 }
 0x15c   : > { %v664_v60 = vpop.f32.mrb[27].mxu1  ;;  %v1356_v4 = vpop.f32.mrb[27].mxu0  ;;  %v2426_v5 = vpack.c.bf16 %v3291_v45, %v3291_v45  ;;  %v1563_v10 = vadd.f32 %v1562_v61, %v1561_v1  ;;  %v1463_v12 = vadd.f32 %v1462_v62, %v1461_v0  ;;  %v3315_v13 = vadd.f32 %v2631_v54, %v2563_v47 }
 0x15d   : > { %v1464_v6 = vsel %vm1416_vm2, %v3302_v53, 0.0  ;;  %v1511_v7 = vmul.f32 %v3302_v53, %v3302_v53  ;;  %v2424_v8 = vpack.c.bf16 %v3302_v53, %v3302_v53  ;;  %v3323_v18 = vadd.f32 %v1356_v4, %v664_v60 }
 0x15e   : > { %2359 = vst.msk [vmem:[%s3040_s28 + $0xe8] sm:$0xf] %vm1850_vm1, %v2426_v5  ;;  %v1513_v19 = vmul.f32 %v3291_v45, %v3291_v45  ;;  %v1465_v21 = vadd.f32 %v1464_v6, %v1463_v12  ;;  %v1565_v23 = vadd.f32 %v1564_v15, %v1563_v10  ;;  %v2427_v27 = vpack.c.bf16 %v3315_v13, %v3315_v13 }
 0x15f   : > { %v1566_v16 = vsel %vm1416_vm2, %v1511_v7, 0.0  ;;  %2357 = vst.msk [vmem:[%s3040_s28 + $0xe0] sm:$0xf] %vm1850_vm1, %v2424_v8  ;;  %v1466_v28 = vsel %vm1416_vm2, %v3323_v18, 0.0  ;;  %v1512_v30 = vmul.f32 %v3323_v18, %v3323_v18  ;;  %v2425_v31 = vpack.c.bf16 %v3323_v18, %v3323_v18 }
 0x160   : > { %v1567_v36 = vadd.f32 %v1566_v16, %v1565_v23  ;;  %v1467_v39 = vadd.f32 %v1466_v28, %v1465_v21  ;;  %v1468_v44 = vsel %vm1416_vm2, %v3291_v45, 0.0  ;;  %v1514_v46 = vmul.f32 %v3315_v13, %v3315_v13  ;;  %2360 = vst.msk [vmem:[%s3040_s28 + $0xec] sm:$0xf] %vm1850_vm1, %v2427_v27 }
 0x161   : > { %v2566_v25 = vpop.f32.mrb[28].mxu1  ;;  %v2634_v32 = vpop.f32.mrb[28].mxu0  ;;  %v1568_v47 = vsel %vm1416_vm2, %v1512_v30, 0.0  ;;  %2358 = vst.msk [vmem:[%s3040_s28 + $0xe4] sm:$0xf] %vm1850_vm1, %v2425_v31  ;;  %v1570_v54 = vsel %vm1416_vm2, %v1513_v19, 0.0 }
 0x162   : > { %v677_v33 = vpop.f32.mrb[29].mxu1  ;;  %v3335_v41 = vadd.f32 %v2634_v32, %v2566_v25  ;;  %v1369_v42 = vpop.f32.mrb[29].mxu0  ;;  %v1470_v60 = vsel %vm1416_vm2, %v3315_v13, 0.0  ;;  %v1469_v61 = vadd.f32 %v1468_v44, %v1467_v39  ;;  %v1569_v62 = vadd.f32 %v1568_v47, %v1567_v36 }
 0x163   : > { %v2567_v43 = vpop.f32.mrb[30].mxu1  ;;  %v3346_v48 = vadd.f32 %v1369_v42, %v677_v33  ;;  %v2635_v49 = vpop.f32.mrb[30].mxu0  ;;  %v1572_v12 = vsel %vm1416_vm2, %v1514_v46, 0.0 }
 0x164   : > { %v680_v50 = vpop.f32.mrb[31].mxu1  ;;  %v1372_v0 = vpop.f32.mrb[31].mxu0  ;;  %v2430_v1 = vpack.c.bf16 %v3335_v41, %v3335_v41  ;;  %v1571_v7 = vadd.f32 %v1570_v54, %v1569_v62  ;;  %v1471_v8 = vadd.f32 %v1470_v60, %v1469_v61  ;;  %v3359_v10 = vadd.f32 %v2635_v49, %v2567_v43 }
 0x165   : > { %v1472_v4 = vsel %vm1416_vm2, %v3346_v48, 0.0  ;;  %v1515_v5 = vmul.f32 %v3346_v48, %v3346_v48  ;;  %v2428_v6 = vpack.c.bf16 %v3346_v48, %v3346_v48  ;;  %v3367_v16 = vadd.f32 %v1372_v0, %v680_v50 }
 0x166   : > { %2363 = vst.msk [vmem:[%s3040_s28 + $0xf8] sm:$0xf] %vm1850_vm1, %v2430_v1  ;;  %v1517_v19 = vmul.f32 %v3335_v41, %v3335_v41  ;;  %v1473_v21 = vadd.f32 %v1472_v4, %v1471_v8  ;;  %v1573_v23 = vadd.f32 %v1572_v12, %v1571_v7  ;;  %v2431_v25 = vpack.c.bf16 %v3359_v10, %v3359_v10 }
 0x167   : > { %v1574_v15 = vsel %vm1416_vm2, %v1515_v5, 0.0  ;;  %2361 = vst.msk [vmem:[%s3040_s28 + $0xf0] sm:$0xf] %vm1850_vm1, %v2428_v6  ;;  %v1474_v27 = vsel %vm1416_vm2, %v3367_v16, 0.0  ;;  %v1516_v28 = vmul.f32 %v3367_v16, %v3367_v16  ;;  %v2429_v30 = vpack.c.bf16 %v3367_v16, %v3367_v16 }
 0x168   : > { %v1575_v31 = vadd.f32 %v1574_v15, %v1573_v23  ;;  %v1475_v32 = vadd.f32 %v1474_v27, %v1473_v21  ;;  %v1476_v33 = vsel %vm1416_vm2, %v3335_v41, 0.0  ;;  %v1518_v36 = vmul.f32 %v3359_v10, %v3359_v10  ;;  %2364 = vst.msk [vmem:[%s3040_s28 + $0xfc] sm:$0xf] %vm1850_vm1, %v2431_v25 }
 0x169   : > { %v1576_v39 = vsel %vm1416_vm2, %v1516_v28, 0.0  ;;  %2362 = vst.msk [vmem:[%s3040_s28 + $0xf4] sm:$0xf] %vm1850_vm1, %v2429_v30  ;;  %v1578_v44 = vsel %vm1416_vm2, %v1517_v19, 0.0  ;;  %v1478_v46 = vsel %vm1416_vm2, %v3359_v10, 0.0 }
 0x16a   : > { %v1477_v42 = vadd.f32 %v1476_v33, %v1475_v32  ;;  %v1577_v43 = vadd.f32 %v1576_v39, %v1575_v31  ;;  %v1580_v50 = vsel %vm1416_vm2, %v1518_v36, 0.0 }
 0x16c   : > { %v1479_v47 = vadd.f32 %v1478_v46, %v1477_v42  ;;  %v1579_v49 = vadd.f32 %v1578_v44, %v1577_v43 }
 0x16e   : > { %v1480_v54 = vrot.slane %v1479_v47, 4  ;;  %v1581_v60 = vadd.f32 %v1580_v50, %v1579_v49 }
 0x170   : > { %v1481_v61 = vadd.f32 %v1480_v54, %v1479_v47  ;;  %v1582_v62 = vrot.slane %v1581_v60, 4 }
 0x172   : > { %v1482_v0 = vrot.slane %v1481_v61, 2  ;;  %v1583_v1 = vadd.f32 %v1582_v62, %v1581_v60 }
 0x174   : > { %v1483_v4 = vadd.f32 %v1482_v0, %v1481_v61  ;;  %v1584_v5 = vrot.slane %v1583_v1, 2 }
 0x176   : > { %v1484_v6 = vrot.slane %v1483_v4, 1  ;;  %v1585_v7 = vadd.f32 %v1584_v5, %v1583_v1 }
 0x178   : > { %v1485_v8 = vadd.f32 %v1484_v6, %v1483_v4  ;;  %v1586_v12 = vrot.slane %v1585_v7, 1 }
 0x17a   : > { %v3392_v15 = vmul.f32 0.00390625, %v1485_v8  ;;  %v1587_v19 = vadd.f32 %v1586_v12, %v1585_v7 }
 0x17c   : > { %v1588_v21 = vmul.f32 0.00390625, %v1587_v19  ;;  %v1589_v23 = vmul.f32 %v3392_v15, %v3392_v15  ;;  %v1603_v27 = vsub.f32 %v3147_v14, %v3392_v15  ;;  %v1606_v28 = vsub.f32 %v3170_v35, %v3392_v15 }
 0x17d   : > { %v1607_v31 = vsub.f32 %v3191_v55, %v3392_v15  ;;  %v1608_v32 = vsub.f32 %v3159_v29, %v3392_v15  ;;  %v1609_v33 = vsub.f32 %v3183_v52, %v3392_v15  ;;  %v1610_v36 = vsub.f32 %v3214_v17, %v3392_v15 }
 0x17e   : > { %v1590_v25 = vsub.f32 %v1588_v21, %v1589_v23  ;;  %v1611_v39 = vsub.f32 %v3235_v40, %v3392_v15  ;;  %v1612_v14 = vsub.f32 %v3203_v9, %v3392_v15  ;;  %v1613_v35 = vsub.f32 %v3227_v34, %v3392_v15 }
 0x17f   : > { %v1614_v55 = vsub.f32 %v3258_v2, %v3392_v15  ;;  %v1615_v29 = vsub.f32 %v3279_v26, %v3392_v15  ;;  %v1616_v52 = vsub.f32 %v3247_v57, %v3392_v15  ;;  %v1617_v17 = vsub.f32 %v3271_v22, %v3392_v15 }
 0x180   : > { %v1591_v30 = vmax.f32 %v1590_v25, 0.0  ;;  %v1618_v40 = vsub.f32 %v3302_v53, %v3392_v15  ;;  %v1619_v9 = vsub.f32 %v3323_v18, %v3392_v15  ;;  %v1620_v34 = vsub.f32 %v3291_v45, %v3392_v15 }
 0x181   : > { %v1621_v2 = vsub.f32 %v3315_v13, %v3392_v15  ;;  %v1622_v26 = vsub.f32 %v3346_v48, %v3392_v15  ;;  %v1623_v57 = vsub.f32 %v3367_v16, %v3392_v15  ;;  %v1624_v22 = vsub.f32 %v3335_v41, %v3392_v15 }
 0x182   : > { %v1592_v42 = vadd.f32 1e-05, %v1591_v30  ;;  %v1625_v53 = vsub.f32 %v3359_v10, %v3392_v15  ;;  %v1594_v18 = vsub.f32 %v3042_v59, %v3392_v15  ;;  %v1595_v45 = vsub.f32 %v3052_v3, %v3392_v15 }
 0x183   : > { %v1596_v13 = vsub.f32 %v3035_v56, %v3392_v15  ;;  %v1597_v48 = vsub.f32 %v3046_v63, %v3392_v15  ;;  %v1598_v16 = vsub.f32 %v3083_v24, %v3392_v15  ;;  %v1599_v41 = vsub.f32 %v3100_v38, %v3392_v15 }
 0x184   : > { %2810 = vrsqrt.f32 %v1592_v42  ;;  %v1600_v10 = vsub.f32 %v3080_v20, %v3392_v15  ;;  %v1601_v59 = vsub.f32 %v3098_v37, %v3392_v15  ;;  %v1602_v3 = vsub.f32 %v3126_v58, %v3392_v15 }
 0x185   : > { %v1604_v56 = vsub.f32 %v3117_v51, %v3392_v15  ;;  %v1605_v63 = vsub.f32 %v3139_v11, %v3392_v15 }
 0x18e   : > { %v2811_v43 = vpop.eup %2810 }
 0x18f   : > { %v1626_v24 = vmul.f32 %v2811_v43, %v1594_v18  ;;  %v1627_v44 = vmul.f32 %v2811_v43, %v1595_v45  ;;  %v1628_v46 = vmul.f32 %v2811_v43, %v1596_v13  ;;  %v1629_v38 = vmul.f32 %v2811_v43, %v1597_v48 }
 0x190   : > { %v1630_v47 = vmul.f32 %v2811_v43, %v1598_v16  ;;  %v1631_v49 = vmul.f32 %v2811_v43, %v1599_v41  ;;  %v1632_v20 = vmul.f32 %v2811_v43, %v1600_v10  ;;  %v1633_v50 = vmul.f32 %v2811_v43, %v1601_v59 }
 0x191   : > { %v3460_v54 = vmul.f32 %v2811_v43, %v1602_v3  ;;  %v3462_v37 = vmul.f32 %v2811_v43, %v1603_v27  ;;  %v3464_v60 = vmul.f32 %v2811_v43, %v1604_v56  ;;  %v3466_v58 = vmul.f32 %v2811_v43, %v1605_v63 }
 0x192   : > { %v3468_v51 = vmul.f32 %v2811_v43, %v1606_v28  ;;  %v3470_v61 = vmul.f32 %v2811_v43, %v1607_v31  ;;  %v3472_v11 = vmul.f32 %v2811_v43, %v1608_v32  ;;  %v3474_v62 = vmul.f32 %v2811_v43, %v1609_v33 }
 0x193   : > { %v3476_v0 = vmul.f32 %v2811_v43, %v1610_v36  ;;  %v3478_v1 = vmul.f32 %v2811_v43, %v1611_v39  ;;  %v3480_v4 = vmul.f32 %v2811_v43, %v1612_v14  ;;  %v3482_v5 = vmul.f32 %v2811_v43, %v1613_v35 }
 0x194   : > { %v3484_v6 = vmul.f32 %v2811_v43, %v1614_v55  ;;  %v3486_v7 = vmul.f32 %v2811_v43, %v1615_v29  ;;  %v3488_v8 = vmul.f32 %v2811_v43, %v1616_v52  ;;  %v3490_v12 = vmul.f32 %v2811_v43, %v1617_v17 }
 0x195   : > { %v3492_v15 = vmul.f32 %v2811_v43, %v1618_v40  ;;  %v3494_v19 = vmul.f32 %v2811_v43, %v1619_v9  ;;  %v3496_v21 = vmul.f32 %v2811_v43, %v1620_v34  ;;  %v3498_v23 = vmul.f32 %v2811_v43, %v1621_v2 }
 0x196   : > { %v3500_v25 = vmul.f32 %v2811_v43, %v1622_v26  ;;  %v3502_v27 = vmul.f32 %v2811_v43, %v1623_v57  ;;  %v3504_v28 = vmul.f32 %v2811_v43, %v1624_v22  ;;  %v3506_v30 = vmul.f32 %v2811_v43, %v1625_v53 }
 0x197   : > { %v1658_v31 = vmul.f32 0.2, %v1626_v24  ;;  %v1659_v32 = vmul.f32 0.2, %v1627_v44  ;;  %v1660_v33 = vmul.f32 0.2, %v1628_v46 }
 0x198   : > { %v1661_v36 = vmul.f32 0.2, %v1629_v38  ;;  %v1662_v39 = vmul.f32 0.2, %v1630_v47  ;;  %v1663_v14 = vmul.f32 0.2, %v1631_v49 }
 0x199   : > { %v1664_v35 = vmul.f32 0.2, %v1632_v20  ;;  %v1665_v42 = vmul.f32 0.2, %v1633_v50  ;;  %v1666_v55 = vmul.f32 0.2, %v3460_v54  ;;  %v3509_v29 = vmax.f32 %v1626_v24, %v1658_v31 }
 0x19a   : > { %v1667_v52 = vmul.f32 0.2, %v3462_v37  ;;  %v1668_v17 = vmul.f32 0.2, %v3464_v60  ;;  %v1669_v40 = vmul.f32 0.2, %v3466_v58  ;;  %v3514_v9 = vmax.f32 %v1627_v44, %v1659_v32 }
 0x19b   : > { %v1670_v34 = vmul.f32 0.2, %v3468_v51  ;;  %v1671_v2 = vmul.f32 0.2, %v3470_v61  ;;  %v1672_v26 = vmul.f32 0.2, %v3472_v11  ;;  %v3519_v57 = vmax.f32 %v1628_v46, %v1660_v33 }
 0x19c   : > { %3700 = vst [vmem:[#allocation2_spill] sm:$0xff] %v3514_v9  ;;  %v1673_v22 = vmul.f32 0.2, %v3474_v62  ;;  %v1674_v53 = vmul.f32 0.2, %v3476_v0  ;;  %v1693_v45 = vmax.f32 %v1629_v38, %v1661_v36  ;;  %v1694_v41 = vmax.f32 %v1630_v47, %v1662_v39 }
 0x19d   : > { %3701 = vst [vmem:[#allocation3_spill] sm:$0xff] %v3519_v57  ;;  %v1675_v18 = vmul.f32 0.2, %v3478_v1  ;;  %v1676_v13 = vmul.f32 0.2, %v3480_v4  ;;  %v1695_v3 = vmax.f32 %v1631_v49, %v1663_v14  ;;  %v1696_v44 = vmax.f32 %v1632_v20, %v1664_v35 }
 0x19e   : > { %v1677_v48 = vmul.f32 0.2, %v3482_v5  ;;  %v1678_v16 = vmul.f32 0.2, %v3484_v6  ;;  %v1679_v10 = vmul.f32 0.2, %v3486_v7  ;;  %v1697_v31 = vmax.f32 %v1633_v50, %v1665_v42 }
 0x19f   : > { %v1680_v43 = vmul.f32 0.2, %v3488_v8  ;;  %v1681_v59 = vmul.f32 0.2, %v3490_v12  ;;  %v1682_v56 = vmul.f32 0.2, %v3492_v15  ;;  %v1698_v49 = vmax.f32 %v3460_v54, %v1666_v55 }
 0x1a0   : > { %v1683_v63 = vmul.f32 0.2, %v3494_v19  ;;  %v1684_v24 = vmul.f32 0.2, %v3496_v21  ;;  %v1685_v46 = vmul.f32 0.2, %v3498_v23  ;;  %v1699_v36 = vmax.f32 %v3462_v37, %v1667_v52 }
 0x1a1   : > { %v1686_v38 = vmul.f32 0.2, %v3500_v25  ;;  %v1687_v47 = vmul.f32 0.2, %v3502_v27  ;;  %v1688_v32 = vmul.f32 0.2, %v3504_v28  ;;  %v1700_v39 = vmax.f32 %v3464_v60, %v1668_v17 }
 0x1a2   : > { %v1689_v33 = vmul.f32 0.2, %v3506_v30  ;;  %v1701_v14 = vmax.f32 %v3466_v58, %v1669_v40  ;;  %v1702_v20 = vmax.f32 %v3468_v51, %v1670_v34  ;;  %v1703_v35 = vmax.f32 %v3470_v61, %v1671_v2 }
 0x1a3   : > { %v1704_v57 = vmax.f32 %v3472_v11, %v1672_v26  ;;  %v1705_v50 = vmax.f32 %v3474_v62, %v1673_v22  ;;  %v1706_v42 = vmax.f32 %v3476_v0, %v1674_v53  ;;  %v1707_v9 = vmax.f32 %v3478_v1, %v1675_v18 }
 0x1a4   : > { %v3549_v54 = vmax.f32 %v3480_v4, %v1676_v13  ;;  %v3552_v37 = vmax.f32 %v3482_v5, %v1677_v48  ;;  %v3555_v60 = vmax.f32 %v3484_v6, %v1678_v16  ;;  %v3558_v58 = vmax.f32 %v3486_v7, %v1679_v10 }
 0x1a5   : > { %v3561_v51 = vmax.f32 %v3488_v8, %v1680_v43  ;;  %v3564_v61 = vmax.f32 %v3490_v12, %v1681_v59  ;;  %v3567_v11 = vmax.f32 %v3492_v15, %v1682_v56  ;;  %v3570_v62 = vmax.f32 %v3494_v19, %v1683_v63  ;;  %v3702_v12 = vld [vmem:[#allocation2_spill] sm:$0xff]  ;;  %v3703_v19 = vld [vmem:[#allocation3_spill] sm:$0xff] }
 0x1a6   : > { %v3573_v0 = vmax.f32 %v3496_v21, %v1684_v24  ;;  %v3576_v1 = vmax.f32 %v3498_v23, %v1685_v46  ;;  %v3579_v4 = vmax.f32 %v3500_v25, %v1686_v38  ;;  %v3582_v5 = vmax.f32 %v3502_v27, %v1687_v47 }
 0x1a7   : > { %v3585_v6 = vmax.f32 %v3504_v28, %v1688_v32  ;;  %v3588_v7 = vmax.f32 %v3506_v30, %v1689_v33  ;;  %v2368_v8 = vpack.c.bf16 %v3509_v29, %v3509_v29  ;;  %v2369_v15 = vpack.c.bf16 %v3702_v12, %v3702_v12 }
 0x1a8   : > { %v2370_v21 = vpack.c.bf16 %v3703_v19, %v3703_v19  ;;  %v2371_v23 = vpack.c.bf16 %v1693_v45, %v1693_v45  ;;  %v2372_v25 = vpack.c.bf16 %v1694_v41, %v1694_v41  ;;  %v2373_v27 = vpack.c.bf16 %v1695_v3, %v1695_v3 }
 0x1a9   : > { %v2374_v28 = vpack.c.bf16 %v1696_v44, %v1696_v44  ;;  %v2375_v55 = vpack.c.bf16 %v1697_v31, %v1697_v31  ;;  %v2376_v30 = vpack.c.bf16 %v1698_v49, %v1698_v49  ;;  %v2377_v52 = vpack.c.bf16 %v1699_v36, %v1699_v36  ;;  %1851 = vst.msk [vmem:[%s3040_s28] sm:$0xf] %vm1850_vm1, %v2368_v8 }
 0x1aa   : > { %1852 = vst.msk [vmem:[%s3040_s28 + $0x4] sm:$0xf] %vm1850_vm1, %v2369_v15  ;;  %v2378_v29 = vpack.c.bf16 %v1700_v39, %v1700_v39  ;;  %v2379_v17 = vpack.c.bf16 %v1701_v14, %v1701_v14  ;;  %v2380_v40 = vpack.c.bf16 %v1702_v20, %v1702_v20  ;;  %v2381_v34 = vpack.c.bf16 %v1703_v35, %v1703_v35 }
 0x1ab   : > { %1853 = vst.msk [vmem:[%s3040_s28 + $0x8] sm:$0xf] %vm1850_vm1, %v2370_v21  ;;  %1854 = vst.msk [vmem:[%s3040_s28 + $0xc] sm:$0xf] %vm1850_vm1, %v2371_v23  ;;  %v2382_v2 = vpack.c.bf16 %v1704_v57, %v1704_v57  ;;  %v2383_v26 = vpack.c.bf16 %v1705_v50, %v1705_v50  ;;  %v2384_v22 = vpack.c.bf16 %v1706_v42, %v1706_v42 }
 0x1ac   : > { %1855 = vst.msk [vmem:[%s3040_s28 + $0x10] sm:$0xf] %vm1850_vm1, %v2372_v25  ;;  %1856 = vst.msk [vmem:[%s3040_s28 + $0x14] sm:$0xf] %vm1850_vm1, %v2373_v27  ;;  %v2385_v53 = vpack.c.bf16 %v1707_v9, %v1707_v9  ;;  %v2386_v18 = vpack.c.bf16 %v3549_v54, %v3549_v54  ;;  %v2387_v57 = vpack.c.bf16 %v3552_v37, %v3552_v37 }
 0x1ad   : > { %1857 = vst.msk [vmem:[%s3040_s28 + $0x18] sm:$0xf] %vm1850_vm1, %v2374_v28  ;;  %1858 = vst.msk [vmem:[%s3040_s28 + $0x1c] sm:$0xf] %vm1850_vm1, %v2375_v55  ;;  %v2388_v9 = vpack.c.bf16 %v3555_v60, %v3555_v60  ;;  %v2389_v45 = vpack.c.bf16 %v3558_v58, %v3558_v58  ;;  %v2390_v13 = vpack.c.bf16 %v3561_v51, %v3561_v51 }
 0x1ae   : > { %1859 = vst.msk [vmem:[%s3040_s28 + $0x20] sm:$0xf] %vm1850_vm1, %v2376_v30  ;;  %1860 = vst.msk [vmem:[%s3040_s28 + $0x24] sm:$0xf] %vm1850_vm1, %v2377_v52  ;;  %v2391_v48 = vpack.c.bf16 %v3564_v61, %v3564_v61  ;;  %v2392_v16 = vpack.c.bf16 %v3567_v11, %v3567_v11  ;;  %v2393_v41 = vpack.c.bf16 %v3570_v62, %v3570_v62 }
 0x1af   : > { %1861 = vst.msk [vmem:[%s3040_s28 + $0x28] sm:$0xf] %vm1850_vm1, %v2378_v29  ;;  %1862 = vst.msk [vmem:[%s3040_s28 + $0x2c] sm:$0xf] %vm1850_vm1, %v2379_v17  ;;  %v2394_v10 = vpack.c.bf16 %v3573_v0, %v3573_v0  ;;  %v2395_v43 = vpack.c.bf16 %v3576_v1, %v3576_v1  ;;  %v2396_v59 = vpack.c.bf16 %v3579_v4, %v3579_v4 }
 0x1b0   : > { %1863 = vst.msk [vmem:[%s3040_s28 + $0x30] sm:$0xf] %vm1850_vm1, %v2380_v40  ;;  %1864 = vst.msk [vmem:[%s3040_s28 + $0x34] sm:$0xf] %vm1850_vm1, %v2381_v34  ;;  %v2397_v3 = vpack.c.bf16 %v3582_v5, %v3582_v5  ;;  %v2398_v56 = vpack.c.bf16 %v3585_v6, %v3585_v6  ;;  %v2399_v63 = vpack.c.bf16 %v3588_v7, %v3588_v7 }
 0x1b1   : > { %1865 = vst.msk [vmem:[%s3040_s28 + $0x38] sm:$0xf] %vm1850_vm1, %v2382_v2  ;;  %1866 = vst.msk [vmem:[%s3040_s28 + $0x3c] sm:$0xf] %vm1850_vm1, %v2383_v26 }
 0x1b2   : > { %1867 = vst.msk [vmem:[%s3040_s28 + $0x40] sm:$0xf] %vm1850_vm1, %v2384_v22  ;;  %1868 = vst.msk [vmem:[%s3040_s28 + $0x44] sm:$0xf] %vm1850_vm1, %v2385_v53 }
 0x1b3   : > { %1869 = vst.msk [vmem:[%s3040_s28 + $0x48] sm:$0xf] %vm1850_vm1, %v2386_v18  ;;  %1870 = vst.msk [vmem:[%s3040_s28 + $0x4c] sm:$0xf] %vm1850_vm1, %v2387_v57 }
 0x1b4   : > { %1871 = vst.msk [vmem:[%s3040_s28 + $0x50] sm:$0xf] %vm1850_vm1, %v2388_v9  ;;  %1872 = vst.msk [vmem:[%s3040_s28 + $0x54] sm:$0xf] %vm1850_vm1, %v2389_v45 }
 0x1b5   : > { %1873 = vst.msk [vmem:[%s3040_s28 + $0x58] sm:$0xf] %vm1850_vm1, %v2390_v13  ;;  %1874 = vst.msk [vmem:[%s3040_s28 + $0x5c] sm:$0xf] %vm1850_vm1, %v2391_v48 }
 0x1b6   : > { %1875 = vst.msk [vmem:[%s3040_s28 + $0x60] sm:$0xf] %vm1850_vm1, %v2392_v16  ;;  %1876 = vst.msk [vmem:[%s3040_s28 + $0x64] sm:$0xf] %vm1850_vm1, %v2393_v41 }
 0x1b7   : > { %1877 = vst.msk [vmem:[%s3040_s28 + $0x68] sm:$0xf] %vm1850_vm1, %v2394_v10  ;;  %1878 = vst.msk [vmem:[%s3040_s28 + $0x6c] sm:$0xf] %vm1850_vm1, %v2395_v43 }
 0x1b8   : > { %1879 = vst.msk [vmem:[%s3040_s28 + $0x70] sm:$0xf] %vm1850_vm1, %v2396_v59  ;;  %1880 = vst.msk [vmem:[%s3040_s28 + $0x74] sm:$0xf] %vm1850_vm1, %v2397_v3 }
 0x1b9   : > { %1881 = vst.msk [vmem:[%s3040_s28 + $0x78] sm:$0xf] %vm1850_vm1, %v2398_v56  ;;  %1882 = vst.msk [vmem:[%s3040_s28 + $0x7c] sm:$0xf] %vm1850_vm1, %v2399_v63 }
 0x1ba PF: > { %s12_s11 = sadd.s32 1, %s2834_s11   ;;  %s3704_s9 = smov %s2830_s10 }
 0x1bb   : > { %p9_p5 = scmp.ge.s32.totalorder %s12_s11, 4   ;;  %s3705_s10 = smov %s3707_s12 }
 0x1bd   :  { %11 = sbr.rel (!%p9_p5) target bundleno = 2 (0x2), region = 65 }

</bundles_post_ra>
